<compile_context>
chip_gen: v5e
topology: v5e:2x2
jax: 0.10.0
libtpu: 0.0.40
codegen_flags: <defaults>
</compile_context>

<pallas_src>
import jax
import jax.numpy as jnp
from jax.experimental import pallas as pl
from jax.experimental.pallas import tpu as pltpu

SELU_ALPHA = 1.6732632423543772
SELU_SCALE = 1.0507009873554805

LANE_COLS = 512                      # preferred lane-dense last dim
MAX_BLOCK_ROWS = 1024                # (1024, 512) f32 = 2 MiB per buffer
MIN_BLOCK_ROWS = 64                  # don't split finer (0.35 us/step overhead)
BLOCK_BYTE_BUDGET = 2 * 1024 * 1024  # per-buffer VMEM budget


def _selu(x):
    # Clamp the exp argument: jnp.where evaluates both branches, and the
    # positive branch's exp would otherwise overflow (then be discarded).
    neg = SELU_ALPHA * (jnp.exp(jnp.minimum(x, 0.0)) - 1.0)
    return SELU_SCALE * jnp.where(x > 0, x, neg)


def _complex_selu_kernel(re_ref, im_ref, re_out_ref, im_out_ref):
    re_out_ref[...] = _selu(re_ref[...])
    im_out_ref[...] = _selu(im_ref[...])


def _pick_cols(n, last_dim):
    """Copy-free slab width: lane-dense if it divides n, else natural last dim."""
    for c in (LANE_COLS, 256, 128):
        if n % c == 0:
            return c
    return max(int(last_dim), 1)


def _pick_block_rows(rows, cols):
    if rows <= MIN_BLOCK_ROWS:
        return rows                               # single full-extent block
    budget = max(8, (BLOCK_BYTE_BUDGET // (cols * 4)) // 8 * 8)
    target = max(MIN_BLOCK_ROWS, rows // 4)       # >= ~4 grid steps (v7x 2 TCs)
    target = max(8, (target // 8) * 8)            # (8,128) rule on the row dim
    return min(target, MAX_BLOCK_ROWS, budget)


@jax.jit
def complex_selu(x):
    """x: complex64 array of any shape (e.g. NCHW). Returns complex64, same shape."""
    orig_shape = x.shape
    re = jnp.real(x).astype(jnp.float32)   # no-op for complex64 input
    im = jnp.imag(x).astype(jnp.float32)
    n = re.size
    if n == 0:
        return jax.lax.complex(re, im)

    last_dim = orig_shape[-1] if len(orig_shape) else 1
    cols = _pick_cols(n, last_dim)
    rows = n // cols                          # exact: cols always divides n
    re2 = re.reshape(rows, cols)              # copy-free reshape, no padding
    im2 = im.reshape(rows, cols)

    block_rows = _pick_block_rows(rows, cols)
    grid = (pl.cdiv(rows, block_rows),)       # ragged last block masked by Pallas
    spec = pl.BlockSpec((block_rows, cols), lambda i: (i, 0))
    out_sd = jax.ShapeDtypeStruct((rows, cols), jnp.float32)

    re_out, im_out = pl.pallas_call(
        _complex_selu_kernel,
        out_shape=(out_sd, out_sd),
        grid_spec=pltpu.PrefetchScalarGridSpec(
            num_scalar_prefetch=0,
            grid=grid,
            in_specs=[spec, spec],
            out_specs=[spec, spec],
        ),
        input_output_aliases={0: 0, 1: 1},    # write back over the dead planes
        compiler_params=pltpu.CompilerParams(
            dimension_semantics=("parallel",),
            vmem_limit_bytes=32 * 1024 * 1024,
        ),
    )(re2, im2)

    return jax.lax.complex(re_out.reshape(orig_shape),
                           im_out.reshape(orig_shape))


def _reference(x):
    re = jnp.real(x)
    im = jnp.imag(x)
    return jax.lax.complex(
        SELU_SCALE * jnp.where(re > 0, re, SELU_ALPHA * (jnp.exp(re) - 1.0)),
        SELU_SCALE * jnp.where(im > 0, im, SELU_ALPHA * (jnp.exp(im) - 1.0)),
    )


if __name__ == "__main__":
    key = jax.random.PRNGKey(0)

    def _make(shape, k):
        k_re, k_im = jax.random.split(k)
        return jax.lax.complex(jax.random.normal(k_re, shape, jnp.float32),
                               jax.random.normal(k_im, shape, jnp.float32))

    k0, k1, k2 = jax.random.split(key, 3)

    # Primary NCHW shape (lane-dense path, single full-extent block).
    x = _make((2, 4, 16, 16), k0)
    y = jax.block_until_ready(complex_selu(x))
    assert y.shape == x.shape and y.dtype == jnp.complex64
    assert jnp.allclose(y, _reference(x), atol=1e-5, rtol=1e-5)

    # Non-128-divisible size -> natural-trailing-dim path, no padding pass.
    x_odd = _make((3, 5, 7), k1)
    y_odd = jax.block_until_ready(complex_selu(x_odd))
    assert jnp.allclose(y_odd, _reference(x_odd), atol=1e-5, rtol=1e-5)

    # 128-divisible but ragged row tiling -> grid=(2,), masked last block.
    x_rag = _make((2, 50, 96), k2)
    y_rag = jax.block_until_ready(complex_selu(x_rag))
    assert jnp.allclose(y_rag, _reference(x_rag), atol=1e-5, rtol=1e-5)

    print("KERNEL_OK")
</pallas_src>

<mosaic_0001>
module attributes {stable_mosaic.version = 11 : i64} {
  func.func @_complex_selu_kernel(%arg0: i32, %arg1: memref<4x512xf32, #tpu.memory_space<vmem>>, %arg2: memref<4x512xf32, #tpu.memory_space<vmem>>, %arg3: memref<4x512xf32, #tpu.memory_space<vmem>>, %arg4: memref<4x512xf32, #tpu.memory_space<vmem>>) attributes {dimension_semantics = [#tpu.dimension_semantics<parallel>], iteration_bounds = array<i64: 1>, scalar_prefetch = 0 : i64, scratch_operands = 0 : i64, tpu.core_type = #tpu.core_type<tc>, window_params = [{transform_indices = @transform_0, window_bounds = array<i64: 4, 512>}, {transform_indices = @transform_1, window_bounds = array<i64: 4, 512>}, {transform_indices = @transform_2, window_bounds = array<i64: 4, 512>}, {transform_indices = @transform_3, window_bounds = array<i64: 4, 512>}]} {
    %c0 = arith.constant 0 : index
    %c0_0 = arith.constant 0 : index
    %0 = vector.load %arg1[%c0, %c0_0] : memref<4x512xf32, #tpu.memory_space<vmem>>, vector<4x512xf32>
    %cst = arith.constant 0.000000e+00 : f32
    %1 = vector.broadcast %cst : f32 to vector<4x512xf32>
    %2 = arith.minimumf %0, %1 : vector<4x512xf32>
    %3 = math.exp %2 : vector<4x512xf32>
    %cst_1 = arith.constant 1.000000e+00 : f32
    %4 = vector.broadcast %cst_1 : f32 to vector<4x512xf32>
    %5 = arith.subf %3, %4 : vector<4x512xf32>
    %cst_2 = arith.constant 1.67326319 : f32
    %6 = vector.broadcast %cst_2 : f32 to vector<4x512xf32>
    %7 = arith.mulf %6, %5 : vector<4x512xf32>
    %cst_3 = arith.constant 0.000000e+00 : f32
    %8 = vector.broadcast %cst_3 : f32 to vector<4x512xf32>
    %9 = arith.cmpf ogt, %0, %8 : vector<4x512xf32>
    %10 = arith.select %9, %0, %7 : vector<4x512xi1>, vector<4x512xf32>
    %cst_4 = arith.constant 1.05070102 : f32
    %11 = vector.broadcast %cst_4 : f32 to vector<4x512xf32>
    %12 = arith.mulf %11, %10 : vector<4x512xf32>
    %c0_5 = arith.constant 0 : index
    %c0_6 = arith.constant 0 : index
    %13 = vector.load %arg3[%c0_5, %c0_6] : memref<4x512xf32, #tpu.memory_space<vmem>>, vector<4x512xf32>
    tpu.vector_store %arg3[%c0_5, %c0_6], %12 {strides = array<i32>} : memref<4x512xf32, #tpu.memory_space<vmem>>, vector<4x512xf32>,
    %c0_7 = arith.constant 0 : index
    %c0_8 = arith.constant 0 : index
    %14 = vector.load %arg2[%c0_7, %c0_8] : memref<4x512xf32, #tpu.memory_space<vmem>>, vector<4x512xf32>
    %cst_9 = arith.constant 0.000000e+00 : f32
    %15 = vector.broadcast %cst_9 : f32 to vector<4x512xf32>
    %16 = arith.minimumf %14, %15 : vector<4x512xf32>
    %17 = math.exp %16 : vector<4x512xf32>
    %cst_10 = arith.constant 1.000000e+00 : f32
    %18 = vector.broadcast %cst_10 : f32 to vector<4x512xf32>
    %19 = arith.subf %17, %18 : vector<4x512xf32>
    %cst_11 = arith.constant 1.67326319 : f32
    %20 = vector.broadcast %cst_11 : f32 to vector<4x512xf32>
    %21 = arith.mulf %20, %19 : vector<4x512xf32>
    %cst_12 = arith.constant 0.000000e+00 : f32
    %22 = vector.broadcast %cst_12 : f32 to vector<4x512xf32>
    %23 = arith.cmpf ogt, %14, %22 : vector<4x512xf32>
    %24 = arith.select %23, %14, %21 : vector<4x512xi1>, vector<4x512xf32>
    %cst_13 = arith.constant 1.05070102 : f32
    %25 = vector.broadcast %cst_13 : f32 to vector<4x512xf32>
    %26 = arith.mulf %25, %24 : vector<4x512xf32>
    %c0_14 = arith.constant 0 : index
    %c0_15 = arith.constant 0 : index
    %27 = vector.load %arg4[%c0_14, %c0_15] : memref<4x512xf32, #tpu.memory_space<vmem>>, vector<4x512xf32>
    tpu.vector_store %arg4[%c0_14, %c0_15], %26 {strides = array<i32>} : memref<4x512xf32, #tpu.memory_space<vmem>>, vector<4x512xf32>,
    return
  }
  func.func @transform_0(%arg0: i32) -> (i32, i32) {
    %c0_i32 = arith.constant 0 : i32
    %c0_i32_0 = arith.constant 0 : i32
    return %arg0, %c0_i32 : i32, i32
  }
  func.func @transform_1(%arg0: i32) -> (i32, i32) {
    %c0_i32 = arith.constant 0 : i32
    %c0_i32_0 = arith.constant 0 : i32
    return %arg0, %c0_i32 : i32, i32
  }
  func.func @transform_2(%arg0: i32) -> (i32, i32) {
    %c0_i32 = arith.constant 0 : i32
    %c0_i32_0 = arith.constant 0 : i32
    return %arg0, %c0_i32 : i32, i32
  }
  func.func @transform_3(%arg0: i32) -> (i32, i32) {
    %c0_i32 = arith.constant 0 : i32
    %c0_i32_0 = arith.constant 0 : i32
    return %arg0, %c0_i32 : i32, i32
  }
}

</mosaic_0001>

<bundles_post_ra>
// kernel: custom-call
= control target key start
LH: loop header
LB: loop body
LE: loop exit
PB: predicated region body
PF: predicated region fallthrough
CT: control target
= control target key end

     0   :  { %2 = vsyncpa [#allocation0], 0  ;;  %s55_s0 = inlined_call_operand.hbm [shape: c64[2,4,16,16], index: 0, kind: input, shape index: {}]   ;;  %s56_s1 = inlined_call_operand.vmem [shape: f32[2,4,16,16], index: 1, kind: output, shape index: {}]  }
   0x1   :  { %s4_s8 = sshll.u32 %s55_s0, 4  ;;  %s6_s11 = sshll.u32 %s56_s1, 4  ;;  %s5_s8 = int_to_ptr.hbm [resolvable:$true] %s4_s8  ;;  %s7_s11 = int_to_ptr.vmem [resolvable:$true] %s6_s11 }
   0x2   :  { %9 = dma.hbm_to_vmem [thread:$0]  %s5_s8, 2048, %s7_s11, [#allocation0] }
   0x3   :  { %37 = dma.done.wait [#allocation0], 2048  }
   0x4   :  { %38 = vsyncadd [#allocation0], 4294965248 }
   0x5   :  { %12 = vsyncpa [#allocation0], 1 }

// kernel: custom-call.1
= control target key start
LH: loop header
LB: loop body
LE: loop exit
PB: predicated region body
PF: predicated region fallthrough
CT: control target
= control target key end

     0   :  { %s56_s0 = inlined_call_operand.hbm [shape: c64[2,4,16,16], index: 0, kind: input, shape index: {}]   ;;  %s57_s1 = inlined_call_operand.vmem [shape: f32[2,4,16,16], index: 1, kind: output, shape index: {}]  }
   0x1   :  { %s2_s8 = scalar_lea.hbm %s56_s0, 128 }
   0x2   :  { %3 = vsyncpa [#allocation0], 0  ;;  %s5_s9 = sshll.u32 %s2_s8, 4  ;;  %s7_s12 = sshll.u32 %s57_s1, 4  ;;  %s6_s9 = int_to_ptr.hbm [resolvable:$true] %s5_s9  ;;  %s8_s12 = int_to_ptr.vmem [resolvable:$true] %s7_s12 }
   0x3   :  { %10 = dma.hbm_to_vmem [thread:$0]  %s6_s9, 2048, %s8_s12, [#allocation0] }
   0x4   :  { %38 = dma.done.wait [#allocation0], 2048  }
   0x5   :  { %39 = vsyncadd [#allocation0], 4294965248 }
   0x6   :  { %13 = vsyncpa [#allocation0], 1 }

// kernel: custom-call.2
= control target key start
LH: loop header
LB: loop body
LE: loop exit
PB: predicated region body
PF: predicated region fallthrough
CT: control target
= control target key end

     0   :  { %s105_s0 = inlined_call_operand.vmem [shape: f32[2,4,16,16], index: 0, kind: input, shape index: {}]   ;;  %s106_s1 = inlined_call_operand.vmem [shape: f32[2,4,16,16], index: 1, kind: input, shape index: {}]   ;;  %s107_s2 = inlined_call_operand.hbm [shape: c64[2,4,16,16], index: 2, kind: output, shape index: {}]  }
   0x1   :  { %s3_s11 = scalar_lea.hbm %s107_s2, 128 }
   0x2   :  { %4 = vsyncpa [#allocation0], 0  ;;  %s6_s14 = sshll.u32 %s105_s0, 4  ;;  %s8_s17 = sshll.u32 %s107_s2, 4  ;;  %s7_s14 = int_to_ptr.vmem [resolvable:$true] %s6_s14  ;;  %s9_s17 = int_to_ptr.hbm [resolvable:$true] %s8_s17 }
   0x3   :  { %11 = dma.vmem_to_hbm [thread:$0]  %s7_s14, 2048, %s9_s17, [#allocation0] }
   0x4   :  { %74 = dma.done.wait [#allocation0], 2048  }
   0x5   :  { %75 = vsyncadd [#allocation0], 4294965248 }
   0x6   :  { %14 = vsyncpa [#allocation0], 1 }
   0x7   :  { %15 = vsyncpa [#allocation1], 0  ;;  %s17_s20 = sshll.u32 %s106_s1, 4  ;;  %s19_s21 = sshll.u32 %s3_s11, 4  ;;  %s18_s20 = int_to_ptr.vmem [resolvable:$true] %s17_s20  ;;  %s20_s21 = int_to_ptr.hbm [resolvable:$true] %s19_s21 }
   0x8   :  { %22 = dma.vmem_to_hbm [thread:$0]  %s18_s20, 2048, %s20_s21, [#allocation1] }
   0x9   :  { %76 = dma.done.wait [#allocation1], 2048  }
   0xa   :  { %77 = vsyncadd [#allocation1], 4294965248 }
   0xb   :  { %25 = vsyncpa [#allocation1], 1 }

// kernel: complex_selu.1
= control target key start
LH: loop header
LB: loop body
LE: loop exit
PB: predicated region body
PF: predicated region fallthrough
CT: control target
= control target key end

     0   :  { %s117_s0 = inlined_call_operand.vmem [shape: f32[4,512], index: 0, kind: input, shape index: {}, may-alias: {0,2}]   ;;  %s118_s1 = inlined_call_operand.vmem [shape: f32[4,512], index: 1, kind: input, shape index: {}, may-alias: {1,3}]   ;;  %s119_s2 = inlined_call_operand.vmem [shape: f32[4,512], index: 2, kind: output, shape index: {0}, may-alias: {0,2}]   ;;  %s120_s3 = inlined_call_operand.vmem [shape: f32[4,512], index: 3, kind: output, shape index: {1}, may-alias: {1,3}]  }
   0x1   :  { %v13_v0 = vld [vmem:[%s117_s0] sm:$0xff]  ;;  %v14_v1 = vld [vmem:[%s117_s0 + $0x8] sm:$0xff] }
   0x2   :  { %v33_v2 = vld [vmem:[%s118_s1] sm:$0xff]  ;;  %v15_v3 = vmin.f32 %v13_v0, 0.0  ;;  %v16_v4 = vmin.f32 %v14_v1, 0.0  ;;  %v34_v5 = vld [vmem:[%s118_s1 + $0x8] sm:$0xff]  ;;  %vm25_vm0 = vcmp.gt.f32.partialorder %v13_v0, 0.0  ;;  %vm26_vm1 = vcmp.gt.f32.partialorder %v14_v1, 0.0 }
   0x3   :  { %v35_v6 = vmin.f32 %v33_v2, 0.0  ;;  %v36_v7 = vmin.f32 %v34_v5, 0.0  ;;  %vm45_vm2 = vcmp.gt.f32.partialorder %v33_v2, 0.0  ;;  %vm46_vm3 = vcmp.gt.f32.partialorder %v34_v5, 0.0 }
   0x4   :  { %v17_v8 = vmul.f32 1.442695, %v15_v3  ;;  %v19_v9 = vmul.f32 1.442695, %v16_v4 }
   0x5   :  { %v37_v10 = vmul.f32 1.442695, %v35_v6  ;;  %v39_v11 = vmul.f32 1.442695, %v36_v7 }
   0x6   :  { %65 = vpow2.f32 %v17_v8 }
   0x7   :  { %67 = vpow2.f32 %v19_v9 }
   0x8   :  { %69 = vpow2.f32 %v37_v10 }
   0x9   :  { %71 = vpow2.f32 %v39_v11 }
   0xc   :  { %v66_v12 = vpop.eup %65 }
   0xd   :  { %v68_v13 = vpop.eup %67  ;;  %v61_v14 = vadd.f32 -1.0, %v66_v12 }
   0xe   :  { %v70_v15 = vpop.eup %69  ;;  %v62_v16 = vadd.f32 -1.0, %v68_v13 }
   0xf   :  { %v72_v17 = vpop.eup %71  ;;  %v23_v18 = vmul.f32 1.6732632, %v61_v14  ;;  %v63_v19 = vadd.f32 -1.0, %v70_v15 }
  0x10   :  { %v24_v20 = vmul.f32 1.6732632, %v62_v16  ;;  %v64_v21 = vadd.f32 -1.0, %v72_v17 }
  0x11   :  { %v27_v22 = vsel %vm25_vm0, %v13_v0, %v23_v18  ;;  %v43_v23 = vmul.f32 1.6732632, %v63_v19 }
  0x12   :  { %v29_v24 = vmul.f32 1.050701, %v27_v22  ;;  %v28_v25 = vsel %vm26_vm1, %v14_v1, %v24_v20  ;;  %v44_v26 = vmul.f32 1.6732632, %v64_v21 }
  0x13   :  { %v30_v27 = vmul.f32 1.050701, %v28_v25  ;;  %v47_v28 = vsel %vm45_vm2, %v33_v2, %v43_v23 }
  0x14   :  { %31 = vst [vmem:[%s119_s2] sm:$0xff] %v29_v24  ;;  %v49_v29 = vmul.f32 1.050701, %v47_v28  ;;  %v48_v30 = vsel %vm46_vm3, %v34_v5, %v44_v26 }
  0x15   :  { %32 = vst [vmem:[%s119_s2 + $0x8] sm:$0xff] %v30_v27  ;;  %v50_v31 = vmul.f32 1.050701, %v48_v30 }
  0x16   :  { %51 = vst [vmem:[%s120_s3] sm:$0xff] %v49_v29 }
  0x17   :  { %52 = vst [vmem:[%s120_s3 + $0x8] sm:$0xff] %v50_v31 }

</bundles_post_ra>
